<compile_context>
chip_gen: v7x
topology: tpu7x:2x2x1
jax: 0.10.0
libtpu: 0.0.40
codegen_flags: <defaults>
</compile_context>

<pallas_src>
import functools

import jax
import jax.numpy as jnp
from jax import lax
from jax.experimental import pallas as pl
from jax.experimental.pallas import tpu as pltpu


def _round_up(v, m):
    return (v + m - 1) // m * m


def agg_kernel(edge_ref, xg_ref, xr_ref, o_ref, msgs_ref, sum_ref, cnt_ref, *,
               constant):
    e = pl.program_id(0)                      # edge tile (outer, reduction)
    i = pl.program_id(1)                      # destination-node tile (inner)
    n_edge_tiles = pl.num_programs(0)

    tn, f_pad = o_ref.shape
    n_pad = xg_ref.shape[0]
    te = edge_ref.shape[1]

    row_start = pl.multiple_of(i * tn, 8)     # tn is always a multiple of 8

    edges = edge_ref[...]                     # (2, TE) int32; padded edges = -1
    src = edges[0:1, :]                       # (1, TE)
    dst = edges[1:2, :]                       # (1, TE)

    # --- init this node tile's accumulators on the first edge tile ----------
    @pl.when(e == 0)
    def _init():
        sum_ref[pl.ds(row_start, tn), :] = jnp.zeros((tn, f_pad), jnp.float32)
        cnt_ref[pl.ds(row_start, tn), :] = jnp.zeros((tn, 1), jnp.float32)

    # --- gather msgs[k, :] = x[src[k], :]  (once per edge tile, at i == 0) ---
    @pl.when(i == 0)
    def _gather():
        node_ids = lax.broadcasted_iota(jnp.int32, (n_pad, te), 0)
        s_onehot = (node_ids == src).astype(jnp.bfloat16)          # (N_pad, TE)
        msgs = lax.dot_general(
            s_onehot, xg_ref[...],
            dimension_numbers=(((0,), (0,)), ((), ())),            # S^T @ X
            preferred_element_type=jnp.float32)                    # (TE, F_pad)
        # Exact: every row is a single bf16 x-row (or zero) -> bf16 cast is lossless.
        msgs_ref[...] = msgs.astype(jnp.bfloat16)

    # --- scatter-accumulate into this node tile's rows ----------------------
    dst_ids = lax.broadcasted_iota(jnp.int32, (tn, te), 0) + row_start
    t_tile = (dst_ids == dst).astype(jnp.bfloat16)                 # (TN, TE)

    sum_ref[pl.ds(row_start, tn), :] += jnp.dot(
        t_tile, msgs_ref[...], preferred_element_type=jnp.float32)
    cnt_ref[pl.ds(row_start, tn), :] += jnp.sum(
        t_tile.astype(jnp.float32), axis=1, keepdims=True)

    # --- finalize on the last edge tile --------------------------------------
    @pl.when(e == n_edge_tiles - 1)
    def _finalize():
        s = sum_ref[pl.ds(row_start, tn), :]
        c = cnt_ref[pl.ds(row_start, tn), :]
        inv_deg = pl.reciprocal(jnp.maximum(c, 1.0), approx=True)
        o_ref[...] = (xr_ref[...] + constant * (s * inv_deg)).astype(o_ref.dtype)


def agg_forward(x, edge_index, constant, *, tile_n=256, tile_e=512):
    """x: (N, F) float node features; edge_index: (2, E) int (row0=src, row1=dst)."""
    N, F = x.shape
    E = edge_index.shape[1]

    # Lane-dense feature axis; (8,128)-friendly node / edge tiles.
    f_pad = _round_up(F, 128)
    tn = min(tile_n, _round_up(N, 8))
    n_pad = _round_up(N, tn)
    te = min(tile_e, _round_up(E, 128))
    e_pad = _round_up(E, te)

    # f32 (x.dtype) copy for the residual add; bf16 copy for the MXU gather.
    x_res = jnp.zeros((n_pad, f_pad), x.dtype).at[:N, :F].set(x)
    x_bf16 = x_res.astype(jnp.bfloat16)
    # Padding edges use index -1 -> match no node -> contribute nothing.
    edges_p = jnp.full((2, e_pad), -1, dtype=jnp.int32).at[:, :E].set(
        edge_index.astype(jnp.int32))

    grid = (e_pad // te, n_pad // tn)

    # --- explicit VMEM budget (review item): resident x + accumulators + tiles
    out_isz = jnp.dtype(x.dtype).itemsize
    vmem_needed = (
        n_pad * f_pad * 2                      # resident bf16 x (single buffer)
        + 2 * tn * f_pad * out_isz             # residual x tiles (double-buffered)
        + 2 * 2 * te * 4                       # edge tiles
        + 2 * tn * f_pad * out_isz             # output tiles
        + n_pad * f_pad * 4                    # f32 sum accumulator (scratch)
        + n_pad * 128 * 4                      # counts (lane-padded) (scratch)
        + te * f_pad * 2                       # bf16 msgs scratch
        + n_pad * te * 2 + tn * te * 2         # in-kernel one-hot temporaries
        + te * f_pad * 4                       # f32 msgs temporary in gather
    )
    try:
        phys_vmem = int(pltpu.get_tpu_info().vmem_capacity_bytes)
    except Exception:                          # conservative fallback (v7x = 64 MiB/TC)
        phys_vmem = 64 * 1024 * 1024
    vmem_limit = max(32 << 20,
                     min(int(vmem_needed * 1.4) + (8 << 20), int(phys_vmem * 0.9)))

    kernel = functools.partial(agg_kernel, constant=float(constant))

    out_p = pl.pallas_call(
        kernel,
        out_shape=jax.ShapeDtypeStruct((n_pad, f_pad), x.dtype),
        grid_spec=pltpu.PrefetchScalarGridSpec(
            num_scalar_prefetch=0,
            grid=grid,
            in_specs=[
                # edge tiles, indexed by the outer (edge) grid axis
                pl.BlockSpec((2, te), lambda e, i: (0, e)),
                # full bf16 x, resident: constant index_map -> single-buffered
                pl.BlockSpec((n_pad, f_pad), lambda e, i: (0, 0),
                             pipeline_mode=pl.Buffered(1)),
                # f32 x tile for the residual add, indexed by the node axis
                pl.BlockSpec((tn, f_pad), lambda e, i: (i, 0)),
            ],
            out_specs=pl.BlockSpec((tn, f_pad), lambda e, i: (i, 0)),
            scratch_shapes=[
                pltpu.VMEM((te, f_pad), jnp.bfloat16),    # msgs (per edge tile)
                pltpu.VMEM((n_pad, f_pad), jnp.float32),  # scatter-sum accumulator
                pltpu.VMEM((n_pad, 1), jnp.float32),      # in-degree counts
            ],
        ),
        compiler_params=pltpu.CompilerParams(
            dimension_semantics=("arbitrary", "arbitrary"),
            vmem_limit_bytes=vmem_limit),
    )(edges_p, x_bf16, x_res)
    return out_p[:N, :F]


def agg_reference(x, edge_index, constant):
    """Pure-JAX reference (PyG mean aggregation)."""
    N = x.shape[0]
    src, dst = edge_index[0], edge_index[1]
    msgs = x[src]                                                   # (E, F)
    sums = jax.ops.segment_sum(msgs, dst, num_segments=N)           # (N, F)
    counts = jax.ops.segment_sum(jnp.ones_like(src, jnp.float32), dst,
                                 num_segments=N)                    # (N,)
    mean_out = sums / jnp.maximum(counts, 1.0)[:, None]
    return x + constant * mean_out


if __name__ == "__main__":
    key = jax.random.PRNGKey(0)
    constant = 0.5
    # Tolerance: aggregated term goes through bf16 message gathering (<= 2^-8
    # relative on x) and an approx (~2^-12) reciprocal; residual x stays f32.
    TOL = 5e-3

    # Test 1: small graph matching the module's toy scale.
    k_x, k_src, k_dst, key = jax.random.split(key, 4)
    N, F, E = 8, 32, 16
    x = jax.random.normal(k_x, (N, F), dtype=jnp.float32)
    src = jax.random.randint(k_src, (E,), 0, N, dtype=jnp.int32)
    dst = jax.random.randint(k_dst, (E,), 0, N, dtype=jnp.int32)
    edge_index = jnp.stack([src, dst], axis=0)

    y = jax.block_until_ready(agg_forward(x, edge_index, constant))
    y_ref = agg_reference(x, edge_index, constant)
    assert y.shape == x.shape and y.dtype == x.dtype
    assert jnp.allclose(y, y_ref, atol=TOL, rtol=TOL), "mismatch vs reference (small)"

    # Test 2: larger graph exercising multiple edge tiles and padding.
    k_x, k_src, k_dst, key = jax.random.split(key, 4)
    N2, F2, E2 = 200, 96, 1000
    x2 = jax.random.normal(k_x, (N2, F2), dtype=jnp.float32)
    src2 = jax.random.randint(k_src, (E2,), 0, N2, dtype=jnp.int32)
    dst2 = jax.random.randint(k_dst, (E2,), 0, N2, dtype=jnp.int32)
    edge_index2 = jnp.stack([src2, dst2], axis=0)

    y2 = jax.block_until_ready(agg_forward(x2, edge_index2, constant))
    y2_ref = agg_reference(x2, edge_index2, constant)
    assert y2.shape == x2.shape and y2.dtype == x2.dtype
    assert jnp.allclose(y2, y2_ref, atol=TOL, rtol=TOL), "mismatch vs reference (tiled E)"

    # Test 3: force multiple node tiles AND multiple edge tiles
    # (exercises the shared msgs scratch and the revisited output blocks).
    k_x, k_src, k_dst, key = jax.random.split(key, 4)
    N3, F3, E3 = 300, 64, 1000
    x3 = jax.random.normal(k_x, (N3, F3), dtype=jnp.float32)
    src3 = jax.random.randint(k_src, (E3,), 0, N3, dtype=jnp.int32)
    dst3 = jax.random.randint(k_dst, (E3,), 0, N3, dtype=jnp.int32)
    edge_index3 = jnp.stack([src3, dst3], axis=0)

    y3 = jax.block_until_ready(
        agg_forward(x3, edge_index3, constant, tile_n=128, tile_e=256))
    y3_ref = agg_reference(x3, edge_index3, constant)
    assert y3.shape == x3.shape and y3.dtype == x3.dtype
    assert jnp.allclose(y3, y3_ref, atol=TOL, rtol=TOL), "mismatch vs reference (tiled N,E)"

    print("KERNEL_OK")
</pallas_src>

<mosaic_0001>
module attributes {stable_mosaic.version = 11 : i64} {
  func.func @agg_kernel(%arg0: i32, %arg1: i32, %arg2: memref<2x128xi32, #tpu.memory_space<vmem>>, %arg3: memref<8x128xbf16, #tpu.memory_space<vmem>>, %arg4: memref<8x128xf32, #tpu.memory_space<vmem>>, %arg5: memref<8x128xf32, #tpu.memory_space<vmem>>, %arg6: memref<128x128xbf16, #tpu.memory_space<vmem>>, %arg7: memref<8x128xf32, #tpu.memory_space<vmem>>, %arg8: memref<8x1xf32, #tpu.memory_space<vmem>>) attributes {dimension_semantics = [#tpu.dimension_semantics<arbitrary>, #tpu.dimension_semantics<arbitrary>], iteration_bounds = array<i64: 1, 1>, scalar_prefetch = 0 : i64, scratch_operands = 3 : i64, tpu.core_type = #tpu.core_type<tc>, window_params = [{transform_indices = @transform_0, window_bounds = array<i64: 2, 128>}, {pipeline_mode = #tpu.pipeline_mode<synchronous>, transform_indices = @transform_1, window_bounds = array<i64: 8, 128>}, {transform_indices = @transform_2, window_bounds = array<i64: 8, 128>}, {transform_indices = @transform_3, window_bounds = array<i64: 8, 128>}]} {
    %c8_i32 = arith.constant 8 : i32
    %0 = arith.muli %arg1, %c8_i32 : i32
    %1 = tpu.assume_multiple %0, 8 : i32
    %c0 = arith.constant 0 : index
    %c0_0 = arith.constant 0 : index
    %2 = vector.load %arg2[%c0, %c0_0] : memref<2x128xi32, #tpu.memory_space<vmem>>, vector<2x128xi32>
    %3 = vector.extract_strided_slice %2 {offsets = [0, 0], sizes = [1, 128], strides = [1, 1]} : vector<2x128xi32> to vector<1x128xi32>
    %4 = vector.extract_strided_slice %2 {offsets = [1, 0], sizes = [1, 128], strides = [1, 1]} : vector<2x128xi32> to vector<1x128xi32>
    %c0_i32 = arith.constant 0 : i32
    %5 = arith.cmpi eq, %arg0, %c0_i32 : i32
    %6 = arith.extui %5 : i1 to i32
    %c0_i32_1 = arith.constant 0 : i32
    %7 = arith.cmpi ne, %6, %c0_i32_1 : i32
    scf.if %7 {
      %cst_13 = arith.constant 0.000000e+00 : f32
      %37 = vector.broadcast %cst_13 : f32 to vector<8x128xf32>
      %38 = arith.index_cast %1 : i32 to index
      %c0_14 = arith.constant 0 : index
      %39 = vector.load %arg7[%38, %c0_14] : memref<8x128xf32, #tpu.memory_space<vmem>>, vector<8x128xf32>
      tpu.vector_store %arg7[%38, %c0_14], %37 {strides = array<i32>} : memref<8x128xf32, #tpu.memory_space<vmem>>, vector<8x128xf32>,
      %cst_15 = arith.constant 0.000000e+00 : f32
      %40 = vector.broadcast %cst_15 : f32 to vector<8x1xf32>
      %41 = arith.index_cast %1 : i32 to index
      %c0_16 = arith.constant 0 : index
      %42 = vector.load %arg8[%41, %c0_16] : memref<8x1xf32, #tpu.memory_space<vmem>>, vector<8x1xf32>
      tpu.vector_store %arg8[%41, %c0_16], %40 {strides = array<i32>} : memref<8x1xf32, #tpu.memory_space<vmem>>, vector<8x1xf32>,
    } else {
    }
    %c0_i32_2 = arith.constant 0 : i32
    %8 = arith.cmpi eq, %arg1, %c0_i32_2 : i32
    %9 = arith.extui %8 : i1 to i32
    %c0_i32_3 = arith.constant 0 : i32
    %10 = arith.cmpi ne, %9, %c0_i32_3 : i32
    scf.if %10 {
      %37 = tpu.iota {dimensions = array<i32: 0>} : vector<8x128xi32>
      %38 = vector.broadcast %3 : vector<1x128xi32> to vector<8x128xi32>
      %39 = arith.cmpi eq, %37, %38 : vector<8x128xi32>
      %40 = arith.extui %39 : vector<8x128xi1> to vector<8x128xi32>
      %41 = arith.sitofp %40 : vector<8x128xi32> to vector<8x128xf32>
      %42 = arith.truncf %41 : vector<8x128xf32> to vector<8x128xbf16>
      %c0_13 = arith.constant 0 : index
      %c0_14 = arith.constant 0 : index
      %43 = vector.load %arg3[%c0_13, %c0_14] : memref<8x128xbf16, #tpu.memory_space<vmem>>, vector<8x128xbf16>
      %cst_15 = arith.constant dense<0.000000e+00> : vector<128x128xf32>
      %44 = tpu.matmul %42, %43, %cst_15 {dimension_numbers = #tpu.dot_dimension_numbers<[0], [0], [1], [1], [0, 1, 1, 1], [], []>} : vector<8x128xbf16>, vector<8x128xbf16>, vector<128x128xf32> -> vector<128x128xf32>
      %45 = arith.truncf %44 : vector<128x128xf32> to vector<128x128xbf16>
      %c0_16 = arith.constant 0 : index
      %c0_17 = arith.constant 0 : index
      %46 = vector.load %arg6[%c0_16, %c0_17] : memref<128x128xbf16, #tpu.memory_space<vmem>>, vector<128x128xbf16>
      tpu.vector_store %arg6[%c0_16, %c0_17], %45 {strides = array<i32>} : memref<128x128xbf16, #tpu.memory_space<vmem>>, vector<128x128xbf16>,
    } else {
    }
    %11 = tpu.iota {dimensions = array<i32: 0>} : vector<8x128xi32>
    %12 = vector.broadcast %1 : i32 to vector<8x128xi32>
    %13 = arith.addi %11, %12 : vector<8x128xi32>
    %14 = vector.broadcast %4 : vector<1x128xi32> to vector<8x128xi32>
    %15 = arith.cmpi eq, %13, %14 : vector<8x128xi32>
    %16 = arith.extui %15 : vector<8x128xi1> to vector<8x128xi32>
    %17 = arith.sitofp %16 : vector<8x128xi32> to vector<8x128xf32>
    %18 = arith.truncf %17 : vector<8x128xf32> to vector<8x128xbf16>
    %19 = arith.index_cast %1 : i32 to index
    %c0_4 = arith.constant 0 : index
    %20 = vector.load %arg7[%19, %c0_4] : memref<8x128xf32, #tpu.memory_space<vmem>>, vector<8x128xf32>
    %c0_5 = arith.constant 0 : index
    %c0_6 = arith.constant 0 : index
    %21 = vector.load %arg6[%c0_5, %c0_6] : memref<128x128xbf16, #tpu.memory_space<vmem>>, vector<128x128xbf16>
    %cst = arith.constant dense<0.000000e+00> : vector<8x128xf32>
    %22 = tpu.matmul %18, %21, %cst {dimension_numbers = #tpu.dot_dimension_numbers<[1], [0], [0], [1], [0, 0, 1, 1], [], []>} : vector<8x128xbf16>, vector<128x128xbf16>, vector<8x128xf32> -> vector<8x128xf32>
    %23 = arith.addf %20, %22 : vector<8x128xf32>
    %24 = arith.index_cast %1 : i32 to index
    %c0_7 = arith.constant 0 : index
    %25 = vector.load %arg7[%24, %c0_7] : memref<8x128xf32, #tpu.memory_space<vmem>>, vector<8x128xf32>
    tpu.vector_store %arg7[%24, %c0_7], %23 {strides = array<i32>} : memref<8x128xf32, #tpu.memory_space<vmem>>, vector<8x128xf32>,
    %26 = arith.index_cast %1 : i32 to index
    %c0_8 = arith.constant 0 : index
    %27 = vector.load %arg8[%26, %c0_8] : memref<8x1xf32, #tpu.memory_space<vmem>>, vector<8x1xf32>
    %28 = arith.extf %18 : vector<8x128xbf16> to vector<8x128xf32>
    %cst_9 = arith.constant dense<0.000000e+00> : vector<8xf32>
    %29 = vector.multi_reduction <add>, %28, %cst_9 [1] : vector<8x128xf32> to vector<8xf32>
    %30 = vector.shape_cast %29 : vector<8xf32> to vector<8x1xf32>
    %31 = arith.addf %27, %30 : vector<8x1xf32>
    %32 = arith.index_cast %1 : i32 to index
    %c0_10 = arith.constant 0 : index
    %33 = vector.load %arg8[%32, %c0_10] : memref<8x1xf32, #tpu.memory_space<vmem>>, vector<8x1xf32>
    tpu.vector_store %arg8[%32, %c0_10], %31 {strides = array<i32>} : memref<8x1xf32, #tpu.memory_space<vmem>>, vector<8x1xf32>,
    %c0_i32_11 = arith.constant 0 : i32
    %34 = arith.cmpi eq, %arg0, %c0_i32_11 : i32
    %35 = arith.extui %34 : i1 to i32
    %c0_i32_12 = arith.constant 0 : i32
    %36 = arith.cmpi ne, %35, %c0_i32_12 : i32
    scf.if %36 {
      %37 = arith.index_cast %1 : i32 to index
      %c0_13 = arith.constant 0 : index
      %38 = vector.load %arg7[%37, %c0_13] : memref<8x128xf32, #tpu.memory_space<vmem>>, vector<8x128xf32>
      %39 = arith.index_cast %1 : i32 to index
      %c0_14 = arith.constant 0 : index
      %40 = vector.load %arg8[%39, %c0_14] : memref<8x1xf32, #tpu.memory_space<vmem>>, vector<8x1xf32>
      %cst_15 = arith.constant 1.000000e+00 : f32
      %41 = vector.broadcast %cst_15 : f32 to vector<8x1xf32>
      %42 = arith.maximumf %40, %41 : vector<8x1xf32>
      %43 = tpu.reciprocal %42 {approx = true} : vector<8x1xf32> -> vector<8x1xf32>
      %c0_16 = arith.constant 0 : index
      %c0_17 = arith.constant 0 : index
      %44 = vector.load %arg4[%c0_16, %c0_17] : memref<8x128xf32, #tpu.memory_space<vmem>>, vector<8x128xf32>
      %45 = vector.broadcast %43 : vector<8x1xf32> to vector<8x128xf32>
      %46 = arith.mulf %38, %45 : vector<8x128xf32>
      %cst_18 = arith.constant 5.000000e-01 : f32
      %47 = vector.broadcast %cst_18 : f32 to vector<8x128xf32>
      %48 = arith.mulf %47, %46 : vector<8x128xf32>
      %49 = arith.addf %44, %48 : vector<8x128xf32>
      %c0_19 = arith.constant 0 : index
      %c0_20 = arith.constant 0 : index
      %50 = vector.load %arg5[%c0_19, %c0_20] : memref<8x128xf32, #tpu.memory_space<vmem>>, vector<8x128xf32>
      tpu.vector_store %arg5[%c0_19, %c0_20], %49 {strides = array<i32>} : memref<8x128xf32, #tpu.memory_space<vmem>>, vector<8x128xf32>,
    } else {
    }
    return
  }
  func.func @transform_0(%arg0: i32, %arg1: i32) -> (i32, i32) {
    %c0_i32 = arith.constant 0 : i32
    %c0_i32_0 = arith.constant 0 : i32
    return %c0_i32, %arg0 : i32, i32
  }
  func.func @transform_1(%arg0: i32, %arg1: i32) -> (i32, i32) {
    %c0_i32 = arith.constant 0 : i32
    %c0_i32_0 = arith.constant 0 : i32
    %c0_i32_1 = arith.constant 0 : i32
    return %c0_i32, %c0_i32_0 : i32, i32
  }
  func.func @transform_2(%arg0: i32, %arg1: i32) -> (i32, i32) {
    %c0_i32 = arith.constant 0 : i32
    %c0_i32_0 = arith.constant 0 : i32
    return %arg1, %c0_i32 : i32, i32
  }
  func.func @transform_3(%arg0: i32, %arg1: i32) -> (i32, i32) {
    %c0_i32 = arith.constant 0 : i32
    %c0_i32_0 = arith.constant 0 : i32
    return %arg1, %c0_i32 : i32, i32
  }
}

</mosaic_0001>

<bundles_post_ra>
// kernel: tpu_custom_call.1
= control target key start
LH: loop header
LB: loop body
LE: loop exit
PB: predicated region body
PF: predicated region fallthrough
CT: control target
= control target key end

     0   :  { %8 = vsyncpa [#allocation6], 0  ;;  %s627_s0 = inlined_call_operand.hbm [shape: s32[2,128], index: 0, kind: input, shape index: {}]   ;;  %s628_s1 = inlined_call_operand.hbm [shape: bf16[8,128], index: 1, kind: input, shape index: {}]   ;;  %s629_s2 = inlined_call_operand.hbm [shape: f32[8,128], index: 2, kind: input, shape index: {}]   ;;  %s630_s3 = inlined_call_operand.hbm [shape: f32[8,128], index: 3, kind: output, shape index: {}]  }
   0x1   :  { %9 = vsyncpa [#allocation9], 0 }
   0x2   :  { %10 = vsyncpa [#allocation7], 0  ;;  %s515_s12 = smov [#allocation8]   ;;  %s516_s14 = smov [#allocation5]  }
   0x3   :  { %s27_s13 = sshll.u32 %s515_s12, 4  ;;  %s17_s15 = sshll.u32 %s516_s14, 4  ;;  %s28_s13 = int_to_ptr.vmem [resolvable:$true] %s27_s13  ;;  %s18_s15 = int_to_ptr.vmem [resolvable:$true] %s17_s15 }
   0x4   :  { %s421_s18 = scalar_lea.hbm %s628_s1, 64 }
   0x5   :  { %p422_p0 = scmp.ne.s32.totalorder %s628_s1, %s421_s18  ;;  %p425_p1 = scmp.lt.u32.totalorder %s421_s18, %s628_s1 }
   0x7   :  { %p427_p2 = pnand %p425_p1, %p422_p0 }
   0x9   :  { %430 = shalt.err (!%p427_p2)
}
   0xa   :  { %s431_s23 = scalar_lea.vmem %s28_s13, 64  ;;  %p436_p4 = scmp.lt.s32.totalorder %s28_s13, %s28_s13 }
   0xb   :  { %p432_p3 = scmp.ne.s32.totalorder %s28_s13, %s431_s23  ;;  %p437_p5 = scmp.lt.s32.totalorder %s431_s23, %s431_s23 }
   0xd   :  { %p438_p6 = por %p437_p5, %p436_p4 }
   0xf   :  { %p439_p7 = pnand %p438_p6, %p432_p3 }
  0x11   :  { %442 = shalt.err (!%p439_p7)
}
  0x12   :  { %30 = dma.hbm_to_vmem [thread:$0]  %s628_s1, 64, %s28_s13, [#allocation9]  }
  0x13   :  { %s443_s28 = scalar_lea.hbm %s627_s0, 32 }
  0x14   :  { %p444_p8 = scmp.ne.s32.totalorder %s627_s0, %s443_s28  ;;  %p447_p9 = scmp.lt.u32.totalorder %s443_s28, %s627_s0 }
  0x16   :  { %p449_p10 = pnand %p447_p9, %p444_p8 }
  0x18   :  { %452 = shalt.err (!%p449_p10)
}
  0x19   :  { %s453_s6 = scalar_lea.vmem %s18_s15, 32  ;;  %p458_p12 = scmp.lt.s32.totalorder %s18_s15, %s18_s15 }
  0x1a   :  { %p454_p11 = scmp.ne.s32.totalorder %s18_s15, %s453_s6  ;;  %p459_p13 = scmp.lt.s32.totalorder %s453_s6, %s453_s6 }
  0x1c   :  { %p460_p0 = por %p459_p13, %p458_p12 }
  0x1e   :  { %p461_p1 = pnand %p460_p0, %p454_p11 }
  0x20   :  { %464 = shalt.err (!%p461_p1)
}
  0x21   :  { %20 = dma.hbm_to_vmem [thread:$0]  %s627_s0, 32, %s18_s15, [#allocation6]  }
  0x22   :  { %s517_s8 = smov [#allocation10]   ;;  %s465_s12 = scalar_lea.hbm %s629_s2, 128 }
  0x23   :  { %s37_s9 = sshll.u32 %s517_s8, 4  ;;  %p466_p2 = scmp.ne.s32.totalorder %s629_s2, %s465_s12  ;;  %s38_s9 = int_to_ptr.vmem [resolvable:$true] %s37_s9 }
  0x24   :  { %p469_p3 = scmp.lt.u32.totalorder %s465_s12, %s629_s2 }
  0x26   :  { %p471_p4 = pnand %p469_p3, %p466_p2 }
  0x28   :  { %474 = shalt.err (!%p471_p4)
}
  0x29   :  { %s475_s18 = scalar_lea.vmem %s38_s9, 128  ;;  %p480_p6 = scmp.lt.s32.totalorder %s38_s9, %s38_s9 }
  0x2a   :  { %p476_p5 = scmp.ne.s32.totalorder %s38_s9, %s475_s18  ;;  %p481_p7 = scmp.lt.s32.totalorder %s475_s18, %s475_s18 }
  0x2c   :  { %p482_p8 = por %p481_p7, %p480_p6 }
  0x2e   :  { %p483_p9 = pnand %p482_p8, %p476_p5 }
  0x30   :  { %486 = shalt.err (!%p483_p9)
}
  0x31   :  { %40 = dma.hbm_to_vmem [thread:$0]  %s629_s2, 128, %s38_s9, [#allocation9]  }
  0x32   :  { %509 = dma.done.wait [#allocation6], 32  }
  0x33   :  { %510 = vsyncadd [#allocation6], 4294967264 }
  0x34   :  { %511 = dma.done.wait [#allocation9], 192  }
  0x35   :  { %512 = vsyncadd [#allocation9], 4294967104  ;;  %v66_v0 = vlaneseq  ;;  %v518_v1 = vmov 0.0   ;;  %vm118_vm0 = vcmask 1043456   ;;  %v52_v4 = vld [vmem:[#allocation5] sm:$0x3] }
  0x36   :  { %388 = vmatprep.subr.bf16.mxu1 %v518_v1  ;;  %v76_v5 = vld [vmem:[#allocation8] sm:$0xf]  ;;  %vm93_vm3 = vcmask 64512   ;;  %vm519_vm4 = vmmov 0   ;;  %vm60_vm5 = vcmask 7168   ;;  %v520_v21 = vmov 0  }
  0x37   :  { %v580_v2 = vshrl.u32 %v66_v0, 7  ;;  %408 = vmatprep.subr.msk.bf16.mxu0 %vm118_vm0, %v76_v5  ;;  %v120_v7 = vsel %vm118_vm0, %v76_v5, 0  ;;  %404 = vmatprep.mubr.msk.bf16.mxu1 %vm519_vm4, %v518_v1  ;;  %61 = vst.msk [vmem:[#allocation4] sm:$0xff] %vm60_vm5, %v518_v1  ;;  %v521_v52 = vmov 1.0|1.0   ;;  %v314_v57 = vld [vmem:[#allocation10] sm:$0xff] }
  0x38   :  { %371 = vmatpush3.bf16.msra.mxu0 %v120_v7  ;;  %417 = vset.pattern.permute.xlu1 %v520_v21  ;;  %s522_s2 = smov [#allocation11]  }
  0x39   :  { %v70_v3 = vsub.s32 0, %v580_v2  ;;  %v241_v10 = vsub.s32 1, %v580_v2  ;;  %s330_s19 = sshll.u32 %s522_s2, 4  ;;  %s331_s19 = int_to_ptr.vmem [resolvable:$true] %s330_s19 }
  0x3a   :  { %s487_s20 = scalar_lea.vmem %s331_s19, 128  ;;  %p492_p11 = scmp.lt.s32.totalorder %s331_s19, %s331_s19 }
  0x3b   :  { %v71_v6 = vrot.slane %v52_v4, %v70_v3  ;;  %v586_v11 = vrot.slane %v52_v4, %v241_v10  ;;  %p488_p10 = scmp.ne.s32.totalorder %s331_s19, %s487_s20  ;;  %p493_p12 = scmp.lt.s32.totalorder %s487_s20, %s487_s20 }
  0x3d   :  { %vm72_vm1 = vcmp.eq.s32.totalorder %v580_v2, %v71_v6  ;;  %vm243_vm2 = vcmp.eq.s32.totalorder %v580_v2, %v586_v11  ;;  %p494_p13 = por %p493_p12, %p492_p11 }
  0x3e   :  { %v340_v8 = vsel %vm72_vm1, 1.0, %v518_v1  ;;  %v349_v12 = vsel %vm243_vm2, 1.0, %v518_v1  ;;  %v300_v23 = vld [vmem:[#allocation4] sm:$0xff]  ;;  %vm350_vm6 = vmpackc.low %vm243_vm2, %vm243_vm2 }
  0x3f   :  { %v75_v9 = vpack.c.bf16 %v340_v8, %v340_v8  ;;  %p495_p0 = pnand %p494_p13, %p488_p10 }
  0x41   :  { %77 = vxpose.xlu0.c.b16.start.end [1/1] (short) %v75_v9, 128 }
  0x4a   :  { %418 = vset.pattern.permute.xlu0 %v520_v21 }
  0x6a   :  { %302 = vadd.xlane.f32.xlu0 %v349_v12 }
  0xa7   :  { %v85_v13 = vpop.trf.xlu0 }
  0xa8   :  { %372 = vmatprep.mubr.msk.bf16.mxu0 %vm93_vm3, %v85_v13 }
  0xab   :  { %v86_v14 = vpop.trf.xlu0 }
  0xac   :  { %373 = vmatmul.mubr.msk.bf16.vlgmr.msra.gmra.mrb[0].mxu0 %vm93_vm3, %v86_v14 }
  0xaf   :  { %v87_v15 = vpop.trf.xlu0 }
  0xb0   :  { %376 = vmatprep.mubr.msk.bf16.mxu0 %vm93_vm3, %v87_v15 }
  0xb3   :  { %v88_v16 = vpop.trf.xlu0 }
  0xb4   :  { %377 = vmatmul.mubr.msk.bf16.gmra.mrb[4].mxu0 %vm93_vm3, %v88_v16 }
  0xb7   :  { %v89_v17 = vpop.trf.xlu0 }
  0xb8   :  { %380 = vmatprep.mubr.msk.bf16.mxu0 %vm93_vm3, %v89_v17 }
  0xbb   :  { %v90_v18 = vpop.trf.xlu0 }
  0xbc   :  { %381 = vmatmul.mubr.msk.bf16.gmra.mrb[8].mxu0 %vm93_vm3, %v90_v18 }
  0xbf   :  { %v91_v19 = vpop.trf.xlu0 }
  0xc0   :  { %384 = vmatprep.mubr.msk.bf16.mxu0 %vm93_vm3, %v91_v19 }
  0xc3   :  { %v92_v20 = vpop.trf.xlu0 }
  0xc4   :  { %385 = vmatmul.mubr.msk.bf16.gmra.mrb[12].mxu0 %vm93_vm3, %v92_v20 }
  0xf7   :  { %v303_v22 = vpop.xlane.xlu0 %302 }
  0xf8   :  { %v304_v24 = vadd.f32 %v303_v22, %v300_v23 }
  0xfa   :  { %306 = vst.msk [vmem:[#allocation4] sm:$0xff] %vm60_vm5, %v304_v24 }
 0x101   :  { %v311_v25 = vld [vmem:[#allocation4] sm:$0xff] }
 0x102   :  { %v312_v26 = vmax.f32 %v311_v25, 1.0 }
 0x104   :  { %419 = vrcp.f32 %v312_v26 }
 0x10e   :  { %v420_v27 = vpop.eup %419 }
 0x10f   :  { %317 = vperm.xlu1 %417, %v420_v27  }
 0x17f   :  { %v374_v28 = vpop.f32.mrb[0].mxu0 }
 0x180   :  { %v156_v29 = vpop.f32.mrb[1].mxu0 }
 0x181   :  { %v375_v30 = vpop.f32.mrb[2].mxu0 }
 0x182   :  { %v220_v31 = vpack.c.bf16 %v375_v30, %v374_v28  ;;  %v159_v32 = vpop.f32.mrb[3].mxu0 }
 0x183   :  { %v219_v33 = vpack.c.bf16 %v159_v32, %v156_v29 }
 0x185   :  { %389 = vmatpush3.bf16.msra.mxu1 %v219_v33 }
 0x186   :  { %390 = vmatprep.subr.bf16.mxu1 %v518_v1 }
 0x187   :  { %v378_v34 = vpop.f32.mrb[4].mxu0 }
 0x188   :  { %v172_v35 = vpop.f32.mrb[5].mxu0 }
 0x189   :  { %v379_v36 = vpop.f32.mrb[6].mxu0  ;;  %391 = vmatpush3.bf16.msra.mxu1 %v220_v31 }
 0x18a   :  { %v222_v37 = vpack.c.bf16 %v379_v36, %v378_v34  ;;  %v175_v38 = vpop.f32.mrb[7].mxu0  ;;  %392 = vmatprep.subr.bf16.mxu1 %v518_v1 }
 0x18b   :  { %v221_v39 = vpack.c.bf16 %v175_v38, %v172_v35 }
 0x18d   :  { %393 = vmatpush3.bf16.msra.mxu1 %v221_v39 }
 0x18e   :  { %394 = vmatprep.subr.bf16.mxu1 %v518_v1  ;;  %v318_v53 = vpop.permute.xlu1 %317 }
 0x18f   :  { %v382_v40 = vpop.f32.mrb[8].mxu0 }
 0x190   :  { %v188_v41 = vpop.f32.mrb[9].mxu0 }
 0x191   :  { %v383_v42 = vpop.f32.mrb[10].mxu0  ;;  %395 = vmatpush3.bf16.msra.mxu1 %v222_v37 }
 0x192   :  { %v224_v43 = vpack.c.bf16 %v383_v42, %v382_v40  ;;  %v191_v44 = vpop.f32.mrb[11].mxu0  ;;  %396 = vmatprep.subr.bf16.mxu1 %v518_v1 }
 0x193   :  { %v223_v45 = vpack.c.bf16 %v191_v44, %v188_v41 }
 0x195   :  { %397 = vmatpush3.bf16.msra.mxu1 %v223_v45 }
 0x196   :  { %398 = vmatprep.subr.bf16.mxu1 %v518_v1 }
 0x197   :  { %v386_v46 = vpop.f32.mrb[12].mxu0 }
 0x198   :  { %v204_v47 = vpop.f32.mrb[13].mxu0 }
 0x199   :  { %v387_v48 = vpop.f32.mrb[14].mxu0  ;;  %399 = vmatpush3.bf16.msra.mxu1 %v224_v43 }
 0x19a   :  { %v226_v49 = vpack.c.bf16 %v387_v48, %v386_v46  ;;  %v207_v50 = vpop.f32.mrb[15].mxu0  ;;  %400 = vmatprep.subr.bf16.mxu1 %v518_v1 }
 0x19b   :  { %v225_v51 = vpack.c.bf16 %v207_v50, %v204_v47 }
 0x19d   :  { %401 = vmatpush3.bf16.msra.mxu1 %v225_v51 }
 0x19e   :  { %402 = vmatprep.subr.bf16.mxu1 %v518_v1 }
 0x1a1   :  { %403 = vmatpush3.bf16.msra.mxu1 %v226_v49 }
 0x1a4   :  { %405 = vmatmul.mubr.msk.bf16.vlgmr.msra.gmra.mrb[0].mxu1 %vm350_vm6, %v521_v52 }
 0x277   :  { %v291_v54 = vpop.f32.mrb[0].mxu1 }
 0x278   :  { %v320_v55 = vmul.f32 %v318_v53, %v291_v54  ;;  %v406_v56 = vpop.f32.mrb[1].mxu1 }
 0x279   :  { %v294_v58 = vpop.f32.mrb[2].mxu1 }
 0x27a   :  { %v321_v59 = vmul.f32 0.5, %v320_v55  ;;  %v407_v60 = vpop.f32.mrb[3].mxu1 }
 0x27c   :  { %v322_v61 = vadd.f32 %v321_v59, %v314_v57 }
 0x27e   :  { %323 = vst [vmem:[#allocation11] sm:$0xff] %v322_v61 }
 0x27f   :  { %498 = shalt.err (!%p495_p0)
}
 0x280   :  { %s499_s23 = scalar_lea.hbm %s630_s3, 128 }
 0x281   :  { %p500_p1 = scmp.ne.s32.totalorder %s630_s3, %s499_s23  ;;  %p503_p2 = scmp.lt.u32.totalorder %s499_s23, %s630_s3 }
 0x283   :  { %p505_p3 = pnand %p503_p2, %p500_p1 }
 0x285   :  { %508 = shalt.err (!%p505_p3)
}
 0x286   :  { %333 = dma.vmem_to_hbm [thread:$0]  %s331_s19, 128, %s630_s3, [#allocation7]  }
 0x287   :  { %513 = dma.done.wait [#allocation7], 128  }
 0x288   :  { %514 = vsyncadd [#allocation7], 4294967168 }
 0x289   :  { %337 = vsyncpa [#allocation6], 1 }
 0x28a   :  { %338 = vsyncpa [#allocation9], 1 }
 0x28b   :  { %339 = vsyncpa [#allocation7], 1 }

</bundles_post_ra>
